<compile_context>
chip_gen: v7x
topology: tpu7x:2x2x1
jax: 0.10.0
libtpu: 0.0.40
codegen_flags: <defaults>
</compile_context>

<pallas_src>
import functools

import jax
import jax.numpy as jnp
from jax.experimental import pallas as pl
from jax.experimental.pallas import tpu as pltpu


def _conv3x3_prelu_kernel(x_ref, w_ref, b_ref, a_ref, o_ref, *, H, W, Cin, Cout):
    # x_ref : (1, Cin, Hp*Wp)  bf16  zero-padded NCHW, spatial flattened row-major
    # w_ref : (9, Cout, Cin)   bf16  taps ordered (kh, kw)
    # b_ref : (Cout, 1)        f32
    # a_ref : (1, 1)           f32   PReLU alpha (single parameter)
    # o_ref : (1, Cout, H*Wp)  bf16  (columns W, W+1 of every row are junk)
    Wp = W + 2
    M = H * Wp
    acc = jnp.zeros((Cout, M), jnp.float32)
    for kh in range(3):
        for kw in range(3):
            base = kh * Wp + kw                       # static lane offset of this tap
            xs = x_ref[0, :, base:base + M]           # (Cin, M)   one contiguous slice
            wt = w_ref[kh * 3 + kw]                   # (Cout, Cin)
            acc += jnp.dot(wt, xs, preferred_element_type=jnp.float32)
    acc = acc + b_ref[...]                            # bias, broadcast over lanes
    out = jnp.where(acc >= 0, acc, a_ref[...] * acc)  # PReLU (single alpha)
    o_ref[0] = out.astype(o_ref.dtype)


def upsample_block(x_nchw, w_oihw, bias, alpha, up_scale, *, compute_dtype=jnp.bfloat16):
    """x_nchw: (N, Cin, H, W) -> (N, Cin, H*r, W*r), matching the torch module."""
    r = up_scale
    N, Cin, H, W = x_nchw.shape
    Cout = Cin * r * r
    assert w_oihw.shape == (Cout, Cin, 3, 3)

    Wp = W + 2          # padded row width
    Hp = H + 3          # 1 top pad row, 1 bottom pad row, +1 extra zero row so the
                        # per-tap slices stay in-bounds for the 2 junk cols of the last row
    Lp = Hp * Wp        # flattened padded spatial length (kernel input lanes)
    M = H * Wp          # flattened output spatial length (incl. 2 junk cols per row)

    # Stay in NCHW: zero-pad spatially, cast to bf16, flatten spatial (fused by XLA).
    xp = jnp.pad(x_nchw.astype(compute_dtype), ((0, 0), (0, 0), (1, 2), (1, 1)))
    xp = xp.reshape(N, Cin, Lp)

    # (Cout, Cin, 3, 3) -> (9, Cout, Cin), taps ordered (kh, kw)
    wk = jnp.transpose(w_oihw.astype(compute_dtype), (2, 3, 0, 1)).reshape(9, Cout, Cin)
    bk = bias.reshape(Cout, 1).astype(jnp.float32)
    ak = jnp.reshape(alpha, (1, 1)).astype(jnp.float32)

    kernel = functools.partial(_conv3x3_prelu_kernel, H=H, W=W, Cin=Cin, Cout=Cout)

    conv = pl.pallas_call(
        kernel,
        out_shape=jax.ShapeDtypeStruct((N, Cout, M), compute_dtype),
        grid_spec=pl.GridSpec(
            grid=(N,),
            in_specs=[
                pl.BlockSpec((1, Cin, Lp), lambda n: (n, 0, 0)),
                pl.BlockSpec((9, Cout, Cin), lambda n: (0, 0, 0)),
                pl.BlockSpec((Cout, 1), lambda n: (0, 0)),
                pl.BlockSpec((1, 1), lambda n: (0, 0)),
            ],
            out_specs=pl.BlockSpec((1, Cout, M), lambda n: (n, 0, 0)),
        ),
        compiler_params=pltpu.CompilerParams(dimension_semantics=("parallel",)),
    )(xp, wk, bk, ak)

    # conv[n, c*r*r + i*r + j, h*Wp + w] -> out[n, c, h*r + i, w*r + j]
    # (strip junk columns + PixelShuffle: a single fused XLA permutation pass,
    #  reading bf16 and writing the final f32.)
    y = conv.reshape(N, Cin, r, r, H, Wp)[..., :W]    # (N, Cin, r, r, H, W)
    y = jnp.transpose(y, (0, 1, 4, 2, 5, 3))          # (N, Cin, H, r, W, r)
    return y.reshape(N, Cin, H * r, W * r).astype(jnp.float32)


def _reference(x_nchw, w_oihw, bias, alpha, r):
    """Pure-JAX reference mirroring torch semantics exactly (f32 conv)."""
    y = jax.lax.conv_general_dilated(
        x_nchw, w_oihw, window_strides=(1, 1),
        padding=((1, 1), (1, 1)),
        dimension_numbers=("NCHW", "OIHW", "NCHW"))
    y = y + bias[None, :, None, None]
    N, C2, H, W = y.shape
    C = C2 // (r * r)
    y = y.reshape(N, C, r, r, H, W).transpose(0, 1, 4, 2, 5, 3).reshape(N, C, H * r, W * r)
    return jnp.where(y >= 0, y, alpha * y)


if __name__ == "__main__":
    # Module config: in_channels=4, up_scale=2  ->  conv: 4 -> 16 channels.
    N, Cin, H, W = 2, 4, 16, 16
    r = 2
    Cout = Cin * r * r

    key = jax.random.PRNGKey(0)
    kx, kw_, kb = jax.random.split(key, 3)
    x = jax.random.normal(kx, (N, Cin, H, W), dtype=jnp.float32)
    fan_in = Cin * 3 * 3
    w = jax.random.normal(kw_, (Cout, Cin, 3, 3), dtype=jnp.float32) * (1.0 / fan_in) ** 0.5
    b = jax.random.normal(kb, (Cout,), dtype=jnp.float32) * 0.1
    alpha = jnp.float32(0.25)  # nn.PReLU() default: single parameter, init 0.25

    fwd = jax.jit(functools.partial(upsample_block, up_scale=r))
    out = jax.block_until_ready(fwd(x, w, b, alpha))

    # Reference computed from the same bf16-rounded operands (kernel uses bf16
    # inputs with f32 accumulation and a bf16 conv-output store).
    x_b = x.astype(jnp.bfloat16).astype(jnp.float32)
    w_b = w.astype(jnp.bfloat16).astype(jnp.float32)
    ref = _reference(x_b, w_b, b, alpha, r)

    assert out.shape == (N, Cin, H * r, W * r), out.shape
    max_err = float(jnp.max(jnp.abs(out - ref)))
    assert jnp.allclose(out, ref, atol=2e-2, rtol=2e-2), max_err

    print("KERNEL_OK")
</pallas_src>

<mosaic_0001>
module attributes {stable_mosaic.version = 11 : i64} {
  func.func @_conv3x3_prelu_kernel(%arg0: i32, %arg1: memref<1x4x342xbf16, #tpu.memory_space<vmem>>, %arg2: memref<9x16x4xbf16, #tpu.memory_space<vmem>>, %arg3: memref<16x1xf32, #tpu.memory_space<vmem>>, %arg4: memref<1x1xf32, #tpu.memory_space<vmem>>, %arg5: memref<1x16x288xbf16, #tpu.memory_space<vmem>>) attributes {dimension_semantics = [#tpu.dimension_semantics<parallel>], iteration_bounds = array<i64: 2>, scalar_prefetch = 0 : i64, scratch_operands = 0 : i64, tpu.core_type = #tpu.core_type<tc>, window_params = [{transform_indices = @transform_0, window_bounds = array<i64: 1, 4, 342>}, {pipeline_mode = #tpu.pipeline_mode<synchronous>, transform_indices = @transform_1, window_bounds = array<i64: 9, 16, 4>}, {pipeline_mode = #tpu.pipeline_mode<synchronous>, transform_indices = @transform_2, window_bounds = array<i64: 16, 1>}, {pipeline_mode = #tpu.pipeline_mode<synchronous>, transform_indices = @transform_3, window_bounds = array<i64: 1, 1>}, {transform_indices = @transform_4, window_bounds = array<i64: 1, 16, 288>}]} {
    %cst = arith.constant 0.000000e+00 : f32
    %0 = vector.broadcast %cst : f32 to vector<16x288xf32>
    %c0 = arith.constant 0 : index
    %c0_0 = arith.constant 0 : index
    %c0_1 = arith.constant 0 : index
    %1 = vector.load %arg1[%c0, %c0_0, %c0_1] : memref<1x4x342xbf16, #tpu.memory_space<vmem>>, vector<1x4x288xbf16>
    %2 = vector.shape_cast %1 : vector<1x4x288xbf16> to vector<4x288xbf16>
    %c0_2 = arith.constant 0 : index
    %c0_3 = arith.constant 0 : index
    %c0_4 = arith.constant 0 : index
    %3 = vector.load %arg2[%c0_2, %c0_3, %c0_4] : memref<9x16x4xbf16, #tpu.memory_space<vmem>>, vector<1x16x4xbf16>
    %4 = vector.shape_cast %3 : vector<1x16x4xbf16> to vector<16x4xbf16>
    %cst_5 = arith.constant dense<0.000000e+00> : vector<16x288xf32>
    %5 = tpu.matmul %4, %2, %cst_5 {dimension_numbers = #tpu.dot_dimension_numbers<[1], [0], [0], [1], [0, 0, 1, 1], [], []>} : vector<16x4xbf16>, vector<4x288xbf16>, vector<16x288xf32> -> vector<16x288xf32>
    %6 = arith.addf %0, %5 : vector<16x288xf32>
    %c0_6 = arith.constant 0 : index
    %c0_7 = arith.constant 0 : index
    %c1 = arith.constant 1 : index
    %7 = vector.load %arg1[%c0_6, %c0_7, %c1] : memref<1x4x342xbf16, #tpu.memory_space<vmem>>, vector<1x4x288xbf16>
    %8 = vector.shape_cast %7 : vector<1x4x288xbf16> to vector<4x288xbf16>
    %c1_8 = arith.constant 1 : index
    %c0_9 = arith.constant 0 : index
    %c0_10 = arith.constant 0 : index
    %9 = vector.load %arg2[%c1_8, %c0_9, %c0_10] : memref<9x16x4xbf16, #tpu.memory_space<vmem>>, vector<1x16x4xbf16>
    %10 = vector.shape_cast %9 : vector<1x16x4xbf16> to vector<16x4xbf16>
    %cst_11 = arith.constant dense<0.000000e+00> : vector<16x288xf32>
    %11 = tpu.matmul %10, %8, %cst_11 {dimension_numbers = #tpu.dot_dimension_numbers<[1], [0], [0], [1], [0, 0, 1, 1], [], []>} : vector<16x4xbf16>, vector<4x288xbf16>, vector<16x288xf32> -> vector<16x288xf32>
    %12 = arith.addf %6, %11 : vector<16x288xf32>
    %c0_12 = arith.constant 0 : index
    %c0_13 = arith.constant 0 : index
    %c2 = arith.constant 2 : index
    %13 = vector.load %arg1[%c0_12, %c0_13, %c2] : memref<1x4x342xbf16, #tpu.memory_space<vmem>>, vector<1x4x288xbf16>
    %14 = vector.shape_cast %13 : vector<1x4x288xbf16> to vector<4x288xbf16>
    %c2_14 = arith.constant 2 : index
    %c0_15 = arith.constant 0 : index
    %c0_16 = arith.constant 0 : index
    %15 = vector.load %arg2[%c2_14, %c0_15, %c0_16] : memref<9x16x4xbf16, #tpu.memory_space<vmem>>, vector<1x16x4xbf16>
    %16 = vector.shape_cast %15 : vector<1x16x4xbf16> to vector<16x4xbf16>
    %cst_17 = arith.constant dense<0.000000e+00> : vector<16x288xf32>
    %17 = tpu.matmul %16, %14, %cst_17 {dimension_numbers = #tpu.dot_dimension_numbers<[1], [0], [0], [1], [0, 0, 1, 1], [], []>} : vector<16x4xbf16>, vector<4x288xbf16>, vector<16x288xf32> -> vector<16x288xf32>
    %18 = arith.addf %12, %17 : vector<16x288xf32>
    %c0_18 = arith.constant 0 : index
    %c0_19 = arith.constant 0 : index
    %c18 = arith.constant 18 : index
    %19 = vector.load %arg1[%c0_18, %c0_19, %c18] : memref<1x4x342xbf16, #tpu.memory_space<vmem>>, vector<1x4x288xbf16>
    %20 = vector.shape_cast %19 : vector<1x4x288xbf16> to vector<4x288xbf16>
    %c3 = arith.constant 3 : index
    %c0_20 = arith.constant 0 : index
    %c0_21 = arith.constant 0 : index
    %21 = vector.load %arg2[%c3, %c0_20, %c0_21] : memref<9x16x4xbf16, #tpu.memory_space<vmem>>, vector<1x16x4xbf16>
    %22 = vector.shape_cast %21 : vector<1x16x4xbf16> to vector<16x4xbf16>
    %cst_22 = arith.constant dense<0.000000e+00> : vector<16x288xf32>
    %23 = tpu.matmul %22, %20, %cst_22 {dimension_numbers = #tpu.dot_dimension_numbers<[1], [0], [0], [1], [0, 0, 1, 1], [], []>} : vector<16x4xbf16>, vector<4x288xbf16>, vector<16x288xf32> -> vector<16x288xf32>
    %24 = arith.addf %18, %23 : vector<16x288xf32>
    %c0_23 = arith.constant 0 : index
    %c0_24 = arith.constant 0 : index
    %c19 = arith.constant 19 : index
    %25 = vector.load %arg1[%c0_23, %c0_24, %c19] : memref<1x4x342xbf16, #tpu.memory_space<vmem>>, vector<1x4x288xbf16>
    %26 = vector.shape_cast %25 : vector<1x4x288xbf16> to vector<4x288xbf16>
    %c4 = arith.constant 4 : index
    %c0_25 = arith.constant 0 : index
    %c0_26 = arith.constant 0 : index
    %27 = vector.load %arg2[%c4, %c0_25, %c0_26] : memref<9x16x4xbf16, #tpu.memory_space<vmem>>, vector<1x16x4xbf16>
    %28 = vector.shape_cast %27 : vector<1x16x4xbf16> to vector<16x4xbf16>
    %cst_27 = arith.constant dense<0.000000e+00> : vector<16x288xf32>
    %29 = tpu.matmul %28, %26, %cst_27 {dimension_numbers = #tpu.dot_dimension_numbers<[1], [0], [0], [1], [0, 0, 1, 1], [], []>} : vector<16x4xbf16>, vector<4x288xbf16>, vector<16x288xf32> -> vector<16x288xf32>
    %30 = arith.addf %24, %29 : vector<16x288xf32>
    %c0_28 = arith.constant 0 : index
    %c0_29 = arith.constant 0 : index
    %c20 = arith.constant 20 : index
    %31 = vector.load %arg1[%c0_28, %c0_29, %c20] : memref<1x4x342xbf16, #tpu.memory_space<vmem>>, vector<1x4x288xbf16>
    %32 = vector.shape_cast %31 : vector<1x4x288xbf16> to vector<4x288xbf16>
    %c5 = arith.constant 5 : index
    %c0_30 = arith.constant 0 : index
    %c0_31 = arith.constant 0 : index
    %33 = vector.load %arg2[%c5, %c0_30, %c0_31] : memref<9x16x4xbf16, #tpu.memory_space<vmem>>, vector<1x16x4xbf16>
    %34 = vector.shape_cast %33 : vector<1x16x4xbf16> to vector<16x4xbf16>
    %cst_32 = arith.constant dense<0.000000e+00> : vector<16x288xf32>
    %35 = tpu.matmul %34, %32, %cst_32 {dimension_numbers = #tpu.dot_dimension_numbers<[1], [0], [0], [1], [0, 0, 1, 1], [], []>} : vector<16x4xbf16>, vector<4x288xbf16>, vector<16x288xf32> -> vector<16x288xf32>
    %36 = arith.addf %30, %35 : vector<16x288xf32>
    %c0_33 = arith.constant 0 : index
    %c0_34 = arith.constant 0 : index
    %c36 = arith.constant 36 : index
    %37 = vector.load %arg1[%c0_33, %c0_34, %c36] : memref<1x4x342xbf16, #tpu.memory_space<vmem>>, vector<1x4x288xbf16>
    %38 = vector.shape_cast %37 : vector<1x4x288xbf16> to vector<4x288xbf16>
    %c6 = arith.constant 6 : index
    %c0_35 = arith.constant 0 : index
    %c0_36 = arith.constant 0 : index
    %39 = vector.load %arg2[%c6, %c0_35, %c0_36] : memref<9x16x4xbf16, #tpu.memory_space<vmem>>, vector<1x16x4xbf16>
    %40 = vector.shape_cast %39 : vector<1x16x4xbf16> to vector<16x4xbf16>
    %cst_37 = arith.constant dense<0.000000e+00> : vector<16x288xf32>
    %41 = tpu.matmul %40, %38, %cst_37 {dimension_numbers = #tpu.dot_dimension_numbers<[1], [0], [0], [1], [0, 0, 1, 1], [], []>} : vector<16x4xbf16>, vector<4x288xbf16>, vector<16x288xf32> -> vector<16x288xf32>
    %42 = arith.addf %36, %41 : vector<16x288xf32>
    %c0_38 = arith.constant 0 : index
    %c0_39 = arith.constant 0 : index
    %c37 = arith.constant 37 : index
    %43 = vector.load %arg1[%c0_38, %c0_39, %c37] : memref<1x4x342xbf16, #tpu.memory_space<vmem>>, vector<1x4x288xbf16>
    %44 = vector.shape_cast %43 : vector<1x4x288xbf16> to vector<4x288xbf16>
    %c7 = arith.constant 7 : index
    %c0_40 = arith.constant 0 : index
    %c0_41 = arith.constant 0 : index
    %45 = vector.load %arg2[%c7, %c0_40, %c0_41] : memref<9x16x4xbf16, #tpu.memory_space<vmem>>, vector<1x16x4xbf16>
    %46 = vector.shape_cast %45 : vector<1x16x4xbf16> to vector<16x4xbf16>
    %cst_42 = arith.constant dense<0.000000e+00> : vector<16x288xf32>
    %47 = tpu.matmul %46, %44, %cst_42 {dimension_numbers = #tpu.dot_dimension_numbers<[1], [0], [0], [1], [0, 0, 1, 1], [], []>} : vector<16x4xbf16>, vector<4x288xbf16>, vector<16x288xf32> -> vector<16x288xf32>
    %48 = arith.addf %42, %47 : vector<16x288xf32>
    %c0_43 = arith.constant 0 : index
    %c0_44 = arith.constant 0 : index
    %c38 = arith.constant 38 : index
    %49 = vector.load %arg1[%c0_43, %c0_44, %c38] : memref<1x4x342xbf16, #tpu.memory_space<vmem>>, vector<1x4x288xbf16>
    %50 = vector.shape_cast %49 : vector<1x4x288xbf16> to vector<4x288xbf16>
    %c8 = arith.constant 8 : index
    %c0_45 = arith.constant 0 : index
    %c0_46 = arith.constant 0 : index
    %51 = vector.load %arg2[%c8, %c0_45, %c0_46] : memref<9x16x4xbf16, #tpu.memory_space<vmem>>, vector<1x16x4xbf16>
    %52 = vector.shape_cast %51 : vector<1x16x4xbf16> to vector<16x4xbf16>
    %cst_47 = arith.constant dense<0.000000e+00> : vector<16x288xf32>
    %53 = tpu.matmul %52, %50, %cst_47 {dimension_numbers = #tpu.dot_dimension_numbers<[1], [0], [0], [1], [0, 0, 1, 1], [], []>} : vector<16x4xbf16>, vector<4x288xbf16>, vector<16x288xf32> -> vector<16x288xf32>
    %54 = arith.addf %48, %53 : vector<16x288xf32>
    %c0_48 = arith.constant 0 : index
    %c0_49 = arith.constant 0 : index
    %55 = vector.load %arg3[%c0_48, %c0_49] : memref<16x1xf32, #tpu.memory_space<vmem>>, vector<16x1xf32>
    %56 = vector.broadcast %55 : vector<16x1xf32> to vector<16x288xf32>
    %57 = arith.addf %54, %56 : vector<16x288xf32>
    %cst_50 = arith.constant 0.000000e+00 : f32
    %58 = vector.broadcast %cst_50 : f32 to vector<16x288xf32>
    %59 = arith.cmpf oge, %57, %58 : vector<16x288xf32>
    %c0_51 = arith.constant 0 : index
    %c0_52 = arith.constant 0 : index
    %60 = vector.load %arg4[%c0_51, %c0_52] : memref<1x1xf32, #tpu.memory_space<vmem>>, vector<1x1xf32>
    %61 = vector.broadcast %60 : vector<1x1xf32> to vector<16x288xf32>
    %62 = arith.mulf %61, %57 : vector<16x288xf32>
    %63 = arith.select %59, %57, %62 : vector<16x288xi1>, vector<16x288xf32>
    %64 = arith.truncf %63 : vector<16x288xf32> to vector<16x288xbf16>
    %c0_53 = arith.constant 0 : index
    %c0_54 = arith.constant 0 : index
    %c0_55 = arith.constant 0 : index
    %65 = vector.load %arg5[%c0_53, %c0_54, %c0_55] : memref<1x16x288xbf16, #tpu.memory_space<vmem>>, vector<1x16x288xbf16>
    %66 = vector.shape_cast %65 : vector<1x16x288xbf16> to vector<16x288xbf16>
    %67 = vector.shape_cast %64 : vector<16x288xbf16> to vector<1x16x288xbf16>
    tpu.vector_store %arg5[%c0_53, %c0_54, %c0_55], %67 {strides = array<i32>} : memref<1x16x288xbf16, #tpu.memory_space<vmem>>, vector<1x16x288xbf16>,
    return
  }
  func.func @transform_0(%arg0: i32) -> (i32, i32, i32) {
    %c0_i32 = arith.constant 0 : i32
    %c0_i32_0 = arith.constant 0 : i32
    %c0_i32_1 = arith.constant 0 : i32
    return %arg0, %c0_i32, %c0_i32_0 : i32, i32, i32
  }
  func.func @transform_1(%arg0: i32) -> (i32, i32, i32) {
    %c0_i32 = arith.constant 0 : i32
    %c0_i32_0 = arith.constant 0 : i32
    %c0_i32_1 = arith.constant 0 : i32
    %c0_i32_2 = arith.constant 0 : i32
    return %c0_i32, %c0_i32_0, %c0_i32_1 : i32, i32, i32
  }
  func.func @transform_2(%arg0: i32) -> (i32, i32) {
    %c0_i32 = arith.constant 0 : i32
    %c0_i32_0 = arith.constant 0 : i32
    %c0_i32_1 = arith.constant 0 : i32
    return %c0_i32, %c0_i32_0 : i32, i32
  }
  func.func @transform_3(%arg0: i32) -> (i32, i32) {
    %c0_i32 = arith.constant 0 : i32
    %c0_i32_0 = arith.constant 0 : i32
    %c0_i32_1 = arith.constant 0 : i32
    return %c0_i32, %c0_i32_0 : i32, i32
  }
  func.func @transform_4(%arg0: i32) -> (i32, i32, i32) {
    %c0_i32 = arith.constant 0 : i32
    %c0_i32_0 = arith.constant 0 : i32
    %c0_i32_1 = arith.constant 0 : i32
    return %arg0, %c0_i32, %c0_i32_0 : i32, i32, i32
  }
}

</mosaic_0001>

<bundles_post_ra>
// kernel: upsample_block.1
= control target key start
LH: loop header
LB: loop body
LE: loop exit
PB: predicated region body
PF: predicated region fallthrough
CT: control target
= control target key end

     0   :  { %s1785_s17 = smov 0   ;;  %s1974_s0 = inlined_call_operand.vmem [shape: bf16[2,4,342], index: 0, kind: input, shape index: {}]   ;;  %s1975_s1 = inlined_call_operand.vmem [shape: bf16[9,16,4], index: 1, kind: input, shape index: {}]   ;;  %s1976_s2 = inlined_call_operand.vmem [shape: f32[16,1], index: 2, kind: input, shape index: {}]   ;;  %s1977_s3 = inlined_call_operand.<no memory space> [shape: f32[1,1], index: 3, kind: input, shape index: {}]   ;;  %s1978_s4 = inlined_call_operand.vmem [shape: bf16[2,16,288], index: 4, kind: output, shape index: {}]  }
   0x1   :  { %v9_v0 = vstv %s1977_s3 }
   0x2   :  { %10 = vst [vmem:[#allocation2] sm:$0x1] %v9_v0 }
   0x3 LB: > { %s1522_s18 = sadd.s32 4294967295, %s1743_s17   ;;  %p1526_p0 = scmp.ge.s32.totalorder %s1743_s17, 1  ;;  %s1743_s17 = sphi %s1785_s17, %s16_s17  }
   0x4   : > { %p164_p1 = scmp.lt.s32.totalorder %s1743_s17, 3 }
   0x6   : > { %p165_p2 = pnand %p1526_p0, %p164_p1 }
   0x7   : > { %p190_p3 = scmp.lt.s32.totalorder (!%p165_p2), %s1522_s18, 1  ;;  %v217_v1 = vlaneseq (!%p165_p2)  ;;  %v1745_v2 = vmov (!%p165_p2), 1983009808   ;;  %v1746_v4 = vmov (!%p165_p2), 0.0   ;;  %vm1747_vm0 = vmmov (!%p165_p2), 0   ;;  %s1749_s22 = smov (!%p165_p2), 127  }
   0x8   : > { %168 = sbr.rel (%p165_p2) target bundleno = 465 (0x1d1), region = 36  ;;  %v215_v3 = vunpack.c.l.s4 (!%p165_p2), %v1745_v2  ;;  %1610 = vmatprep.subr.bf16.mxu1 (!%p165_p2), %v1746_v4  ;;  %1612 = vmatprep.mubr.msk.bf16.mxu1 (!%p165_p2), %vm1747_vm0, %v1746_v4  ;;  %v1748_v7 = vmov (!%p165_p2), 0   ;;  %s1750_s23 = smov (!%p165_p2), 126   ;;  %v1397_v49 = vld [vmem:[%s1976_s2 + $0x8] sm:$0xff] (!%p165_p2)  ;;  %v1396_v50 = vld [vmem:[%s1976_s2] sm:$0xff] (!%p165_p2)  ;;  %vm242_vm1 = vcmask (!%p165_p2), 1041408  }
   0x9   : > { %v218_v5 = vshrl.u32 (!%p165_p2), %v217_v1, 7  ;;  %284 = vmatprep.mubr.bf16.mxu0 (!%p165_p2), %v1748_v7  ;;  %1719 = vset.pattern.permute.xlu1 (!%p165_p2), %v1748_v7  ;;  %s1751_s24 = smov (!%p165_p2), 110   ;;  %s1752_s25 = smov (!%p165_p2), 109   ;;  %v1581_v51 = vld [vmem:[#allocation2] ss:$0 sm:$0xff] (!%p165_p2)  ;;  %vm235_vm2 = vcmask (!%p165_p2), 1039360  }
   0xa   : > { %v216_v6 = vunpack.c.0.s8 (!%p165_p2), %v215_v3  ;;  %1718 = vset.pattern.permute.xlu0 (!%p165_p2), %v1748_v7  ;;  %s1753_s26 = smov (!%p165_p2), 108   ;;  %s1754_s27 = smov (!%p165_p2), 92   ;;  %v1728_v55 = vld [vmem:[%s1975_s1 + $0x8] sm:$0xff] (!%p165_p2)   ;;  %vm238_vm3 = vcmask (!%p165_p2), 31744   ;;  %vm469_vm4 = vcmask (!%p165_p2), 1031168   ;;  %v1729_v1 = vld [vmem:[%s1975_s1] sm:$0xff] (!%p165_p2)  }
   0xb   : > { %s1755_s28 = smov (!%p165_p2), 91   ;;  %s1756_s29 = smov (!%p165_p2), 90   ;;  %vm606_vm5 = vcmask (!%p165_p2), 900096   ;;  %vm743_vm6 = vcmask (!%p165_p2), 891904   ;;  %vm880_vm7 = vcmask (!%p165_p2), 883712   ;;  %vm1017_vm8 = vcmask (!%p165_p2), 752640  }
   0xc   : > { %v1801_v8 = vsub.s32 (!%p165_p2), %v216_v6, %v218_v5  ;;  %vm1154_vm9 = vcmask (!%p165_p2), 744448   ;;  %vm1291_vm10 = vcmask (!%p165_p2), 736256   ;;  %vm1463_vm13 = vcmask (!%p165_p2), 257024  }
   0xf   : > { %s1980_s18 = smov (!%p190_p3, %s1522_s18), 1 }
  0x10   : > { %s1696_s3 = smul.u32 6, %s1980_s18 }
  0x12   : > { %s1807_s21 = scalar_lea.vmem %s1974_s0, %s1696_s3 }
  0x13   : > { %v201_v9 = vld [vmem:[%s1807_s21] sm:$0x3f] }
  0x14   : > { %v1811_v10 = vrot.slane %v201_v9, %v1801_v8  ;;  %v213_v11 = vcombine.high %v201_v9, %v201_v9  ;;  %v437_v12 = vld [vmem:[%s1807_s21] sm:$0x3f] }
  0x15   : > { %v454_v15 = vrot.slane %v437_v12, %v1801_v8  ;;  %v447_v16 = vcombine.high %v437_v12, %v437_v12  ;;  %v574_v18 = vld [vmem:[%s1807_s21] sm:$0x3f] }
  0x16   : > { %229 = vrot.lane.b32.xlu0 %v1811_v10, %s1749_s22  ;;  %v1816_v13 = vrot.slane %v213_v11, %v1801_v8  ;;  %v1820_v14 = vcombine.high %v1811_v10, %v1811_v10  ;;  %v591_v20 = vrot.slane %v574_v18, %v1801_v8  ;;  %v584_v21 = vcombine.high %v574_v18, %v574_v18  ;;  %v711_v23 = vld [vmem:[%s1807_s21] sm:$0x3f] }
  0x17   : > { %v462_v17 = vcombine.high %v454_v15, %v454_v15  ;;  %v461_v19 = vrot.slane %v447_v16, %v1801_v8  ;;  %v728_v25 = vrot.slane %v711_v23, %v1801_v8  ;;  %v721_v26 = vcombine.high %v711_v23, %v711_v23  ;;  %v848_v28 = vld [vmem:[%s1807_s21] sm:$0x3f] }
  0x18   : > { %233 = vrot.lane.b32.xlu1 %v1816_v13, %s1749_s22  ;;  %v599_v22 = vcombine.high %v591_v20, %v591_v20  ;;  %v598_v24 = vrot.slane %v584_v21, %v1801_v8  ;;  %v865_v30 = vrot.slane %v848_v28, %v1801_v8  ;;  %v858_v31 = vcombine.high %v848_v28, %v848_v28  ;;  %v985_v33 = vld [vmem:[%s1807_s21] sm:$0x3f] }
  0x19   : > { %v736_v27 = vcombine.high %v728_v25, %v728_v25  ;;  %v735_v29 = vrot.slane %v721_v26, %v1801_v8  ;;  %v1002_v35 = vrot.slane %v985_v33, %v1801_v8  ;;  %v995_v36 = vcombine.high %v985_v33, %v985_v33  ;;  %v1122_v38 = vld [vmem:[%s1807_s21] sm:$0x3f] }
  0x1a   : > { %231 = vrot.lane.b32.xlu0 %v1820_v14, %s1749_s22  ;;  %v873_v32 = vcombine.high %v865_v30, %v865_v30  ;;  %v872_v34 = vrot.slane %v858_v31, %v1801_v8  ;;  %v1139_v40 = vrot.slane %v1122_v38, %v1801_v8  ;;  %v1132_v41 = vcombine.high %v1122_v38, %v1122_v38  ;;  %v1259_v43 = vld [vmem:[%s1807_s21] sm:$0x3f]  ;;  %v1733_v31 = vld [vmem:[%s1975_s1 + $0x28] sm:$0xff]   ;;  %v1734_v38 = vld [vmem:[%s1975_s1 + $0x30] sm:$0xff]  }
  0x1b   : > { %v1010_v37 = vcombine.high %v1002_v35, %v1002_v35  ;;  %v1009_v39 = vrot.slane %v995_v36, %v1801_v8  ;;  %v1276_v45 = vrot.slane %v1259_v43, %v1801_v8  ;;  %v1269_v46 = vcombine.high %v1259_v43, %v1259_v43 }
  0x1c   : > { %463 = vrot.lane.b32.xlu1 %v454_v15, %s1750_s23  ;;  %v1147_v42 = vcombine.high %v1139_v40, %v1139_v40  ;;  %v1146_v44 = vrot.slane %v1132_v41, %v1801_v8  ;;  %v351_v59 = vsel %vm242_vm1, %v1816_v13, 0  ;;  %v345_v62 = vsel %vm242_vm1, %v1811_v10, 0  ;;  %v1730_v10 = vld [vmem:[%s1975_s1 + $0x10] sm:$0xff]  }
  0x1d   : > { %v1284_v47 = vcombine.high %v1276_v45, %v1276_v45  ;;  %v1283_v48 = vrot.slane %v1269_v46, %v1801_v8 }
  0x1e   : > { %465 = vrot.lane.b32.xlu0 %v462_v17, %s1750_s23  ;;  %v1731_v17 = vld [vmem:[%s1975_s1 + $0x18] sm:$0xff]  }
  0x20   : > { %467 = vrot.lane.b32.xlu1 %v461_v19, %s1750_s23 }
  0x22   : > { %600 = vrot.lane.b32.xlu0 %v591_v20, %s1751_s24 }
  0x24   : > { %602 = vrot.lane.b32.xlu1 %v599_v22, %s1751_s24 }
  0x26   : > { %604 = vrot.lane.b32.xlu0 %v598_v24, %s1751_s24 }
  0x28   : > { %737 = vrot.lane.b32.xlu1 %v728_v25, %s1752_s25  ;;  %v1732_v25 = vld [vmem:[%s1975_s1 + $0x20] sm:$0xff]  }
  0x2a   : > { %739 = vrot.lane.b32.xlu0 %v736_v27, %s1752_s25 }
  0x2c   : > { %741 = vrot.lane.b32.xlu1 %v735_v29, %s1752_s25 }
  0x2e   : > { %874 = vrot.lane.b32.xlu0 %v865_v30, %s1753_s26 }
  0x30   : > { %876 = vrot.lane.b32.xlu1 %v873_v32, %s1753_s26 }
  0x32   : > { %878 = vrot.lane.b32.xlu0 %v872_v34, %s1753_s26 }
  0x34   : > { %1011 = vrot.lane.b32.xlu1 %v1002_v35, %s1754_s27 }
  0x36   : > { %1013 = vrot.lane.b32.xlu0 %v1010_v37, %s1754_s27 }
  0x38   : > { %1015 = vrot.lane.b32.xlu1 %v1009_v39, %s1754_s27  ;;  %s1697_s27 = smul.u32 24, %s1980_s18 }
  0x3a   : > { %1148 = vrot.lane.b32.xlu0 %v1139_v40, %s1755_s28  ;;  %s199_s30 = scalar_lea.vmem %s1978_s4, %s1697_s27 }
  0x3c   : > { %1150 = vrot.lane.b32.xlu1 %v1147_v42, %s1755_s28 }
  0x3e   : > { %1152 = vrot.lane.b32.xlu0 %v1146_v44, %s1755_s28 }
  0x40   : > { %1285 = vrot.lane.b32.xlu1 %v1276_v45, %s1756_s29  ;;  %v1735_v45 = vld [vmem:[%s1975_s1 + $0x38] sm:$0xff]  }
  0x42   : > { %1287 = vrot.lane.b32.xlu0 %v1284_v47, %s1756_s29 }
  0x44   : > { %1289 = vrot.lane.b32.xlu1 %v1283_v48, %s1756_s29  ;;  %v1736_v48 = vld [vmem:[%s1975_s1 + $0x40] sm:$0xff]  }
  0x46   : > { %1400 = vperm.xlu0 %1718, %v1396_v50  }
  0x48   : > { %1405 = vperm.xlu1 %1719, %v1397_v49  }
  0x4c   : > { %1427 = vperm.xlu1 %1719, %v1581_v51  }
  0x88   : > { %v230_v52 = vpop.permute.xlu0 %229 }
  0x8a   : > { %v234_v53 = vpop.permute.xlu1 %233 }
  0x8b   : > { %v250_v54 = vsel %vm242_vm1, %v234_v53, 0 }
  0x8c   : > { %v232_v56 = vpop.permute.xlu0 %231  ;;  %1611 = vmatpush3.bf16.msra.mxu1 %v250_v54 }
  0x8d   : > { %v237_v57 = vsel %vm235_vm2, %v232_v56, %v234_v53  ;;  %v236_v58 = vsel %vm235_vm2, %v230_v52, %v232_v56  ;;  %1616 = vmatprep.subr.bf16.mxu1 %v1746_v4 }
  0x8e   : > { %1532 = vmatprep.subr.msk.bf16.mxu0 %vm242_vm1, %v237_v57  ;;  %v244_v60 = vsel %vm242_vm1, %v236_v58, 0  ;;  %v464_v61 = vpop.permute.xlu1 %463 }
  0x8f   : > { %253 = vmatpush1.bf16.msra.mxu0 %v244_v60  ;;  %1613 = vmatmul.mubr.msk.bf16.vlgmr.msra.gmra.mrb[0].mxu1 %vm238_vm3, %v1728_v55 }
  0x90   : > { %1536 = vmatprep.subr.msk.bf16.mxu0 %vm242_vm1, %v1820_v14  ;;  %1617 = vmatpush3.bf16.msra.mxu1 %v351_v59  ;;  %v466_v63 = vpop.permute.xlu0 %465 }
  0x91   : > { %1618 = vmatprep.mubr.msk.bf16.mxu1 %vm1747_vm0, %v1746_v4  ;;  %1622 = vmatprep.subr.bf16.mxu1 %v1746_v4  ;;  %v470_v8 = vsel %vm469_vm4, %v464_v61, %v466_v63 }
  0x92   : > { %1533 = vmatmul.mubr.msk.bf16.vlgmr.msra.gmra.mrb[0].mxu0 %vm238_vm3, %v1728_v55  ;;  %v468_v0 = vpop.permute.xlu1 %467  ;;  %v476_v11 = vsel %vm242_vm1, %v470_v8, 0 }
  0x93   : > { %354 = vmatpush1.bf16.msra.mxu0 %v345_v62  ;;  %v471_v2 = vsel %vm469_vm4, %v466_v63, %v468_v0  ;;  %385 = vmatprep.mubr.bf16.mxu0 %v1748_v7  ;;  %v482_v5 = vsel %vm242_vm1, %v468_v0, 0 }
  0x94   : > { %1542 = vmatprep.subr.msk.bf16.mxu0 %vm242_vm1, %v471_v2  ;;  %v601_v3 = vpop.permute.xlu0 %600 }
  0x96   : > { %v603_v6 = vpop.permute.xlu1 %602 }
  0x97   : > { %1619 = vmatmul.mubr.msk.bf16.vlgmr.msra.gmra.mrb[4].mxu1 %vm238_vm3, %v1729_v1  ;;  %v607_v19 = vsel %vm606_vm5, %v601_v3, %v603_v6 }
  0x98   : > { %1623 = vmatpush3.bf16.msra.mxu1 %v482_v5  ;;  %1624 = vmatprep.mubr.msk.bf16.mxu1 %vm1747_vm0, %v1746_v4  ;;  %v605_v9 = vpop.permute.xlu0 %604  ;;  %v613_v22 = vsel %vm242_vm1, %v607_v19, 0 }
  0x99   : > { %1628 = vmatprep.subr.bf16.mxu1 %v1746_v4  ;;  %v619_v13 = vsel %vm242_vm1, %v605_v9, 0  ;;  %v608_v14 = vsel %vm606_vm5, %v603_v6, %v605_v9 }
  0x9a   : > { %v738_v12 = vpop.permute.xlu1 %737 }
  0x9c   : > { %v740_v15 = vpop.permute.xlu0 %739 }
  0x9d   : > { %v744_v29 = vsel %vm743_vm6, %v738_v12, %v740_v15 }
  0x9e   : > { %1537 = vmatmul.mubr.msk.bf16.vlgmr.msra.gmra.mrb[0].mxu0 %vm238_vm3, %v1729_v1  ;;  %v742_v16 = vpop.permute.xlu1 %741  ;;  %v750_v32 = vsel %vm242_vm1, %v744_v29, 0 }
  0x9f   : > { %485 = vmatpush1.bf16.msra.mxu0 %v476_v11  ;;  %1625 = vmatmul.mubr.msk.bf16.vlgmr.msra.gmra.mrb[8].mxu1 %vm238_vm3, %v1730_v10  ;;  %v756_v20 = vsel %vm242_vm1, %v742_v16, 0  ;;  %v745_v23 = vsel %vm743_vm6, %v740_v15, %v742_v16 }
  0xa0   : > { %1629 = vmatpush3.bf16.msra.mxu1 %v619_v13  ;;  %1630 = vmatprep.mubr.msk.bf16.mxu1 %vm1747_vm0, %v1746_v4  ;;  %v875_v18 = vpop.permute.xlu0 %874 }
  0xa1   : > { %516 = vmatprep.mubr.bf16.mxu0 %v1748_v7  ;;  %1548 = vmatprep.subr.msk.bf16.mxu0 %vm242_vm1, %v608_v14 }
  0xa2   : > { %1634 = vmatprep.subr.bf16.mxu1 %v1746_v4  ;;  %v877_v21 = vpop.permute.xlu1 %876 }
  0xa3   : > { %v881_v40 = vsel %vm880_vm7, %v875_v18, %v877_v21 }
  0xa4   : > { %v879_v24 = vpop.permute.xlu0 %878  ;;  %v887_v42 = vsel %vm242_vm1, %v881_v40, 0 }
  0xa5   : > { %v893_v27 = vsel %vm242_vm1, %v879_v24, 0  ;;  %v882_v35 = vsel %vm880_vm7, %v877_v21, %v879_v24 }
  0xa6   : > { %v1012_v26 = vpop.permute.xlu1 %1011 }
  0xa7   : > { %1631 = vmatmul.mubr.msk.bf16.vlgmr.msra.gmra.mrb[12].mxu1 %vm238_vm3, %v1731_v17 }
  0xa8   : > { %1635 = vmatpush3.bf16.msra.mxu1 %v756_v20  ;;  %1636 = vmatprep.mubr.msk.bf16.mxu1 %vm1747_vm0, %v1746_v4  ;;  %v1014_v28 = vpop.permute.xlu0 %1013 }
  0xa9   : > { %1640 = vmatprep.subr.bf16.mxu1 %v1746_v4  ;;  %v1018_v47 = vsel %vm1017_vm8, %v1012_v26, %v1014_v28 }
  0xaa   : > { %1543 = vmatmul.mubr.msk.bf16.vlgmr.msra.gmra.mrb[0].mxu0 %vm238_vm3, %v1730_v10  ;;  %v1016_v30 = vpop.permute.xlu1 %1015  ;;  %v1024_v49 = vsel %vm242_vm1, %v1018_v47, 0 }
  0xab   : > { %622 = vmatpush1.bf16.msra.mxu0 %v613_v22  ;;  %653 = vmatprep.mubr.bf16.mxu0 %v1748_v7  ;;  %v1030_v34 = vsel %vm242_vm1, %v1016_v30, 0  ;;  %v1019_v43 = vsel %vm1017_vm8, %v1014_v28, %v1016_v30 }
  0xac   : > { %1554 = vmatprep.subr.msk.bf16.mxu0 %vm242_vm1, %v745_v23  ;;  %v1149_v33 = vpop.permute.xlu0 %1148 }
  0xae   : > { %v1151_v36 = vpop.permute.xlu1 %1150 }
  0xaf   : > { %1637 = vmatmul.mubr.msk.bf16.vlgmr.msra.gmra.mrb[16].mxu1 %vm238_vm3, %v1732_v25 }
  0xb0   : > { %1641 = vmatpush3.bf16.msra.mxu1 %v893_v27  ;;  %1642 = vmatprep.mubr.msk.bf16.mxu1 %vm1747_vm0, %v1746_v4  ;;  %v1153_v37 = vpop.permute.xlu0 %1152 }
  0xb1   : > { %1646 = vmatprep.subr.bf16.mxu1 %v1746_v4  ;;  %v1167_v41 = vsel %vm242_vm1, %v1153_v37, 0  ;;  %v1156_v50 = vsel %vm1154_vm9, %v1151_v36, %v1153_v37 }
  0xb2   : > { %v1286_v39 = vpop.permute.xlu1 %1285 }
  0xb4   : > { %v1288_v51 = vpop.permute.xlu0 %1287 }
  0xb5   : > { %v1292_v54 = vsel %vm1291_vm10, %v1286_v39, %v1288_v51 }
  0xb6   : > { %1549 = vmatmul.mubr.msk.bf16.vlgmr.msra.gmra.mrb[0].mxu0 %vm238_vm3, %v1731_v17  ;;  %v1290_v44 = vpop.permute.xlu1 %1289  ;;  %v1298_v55 = vsel %vm242_vm1, %v1292_v54, 0 }
  0xb7   : > { %759 = vmatpush1.bf16.msra.mxu0 %v750_v32  ;;  %1643 = vmatmul.mubr.msk.bf16.vlgmr.msra.gmra.mrb[20].mxu1 %vm238_vm3, %v1733_v31  ;;  %v1304_v46 = vsel %vm242_vm1, %v1290_v44, 0  ;;  %v1293_v53 = vsel %vm1291_vm10, %v1288_v51, %v1290_v44 }
  0xb8   : > { %1647 = vmatpush3.bf16.msra.mxu1 %v1030_v34  ;;  %1648 = vmatprep.mubr.msk.bf16.mxu1 %vm1747_vm0, %v1746_v4 }
  0xb9   : > { %790 = vmatprep.mubr.bf16.mxu0 %v1748_v7  ;;  %1560 = vmatprep.subr.msk.bf16.mxu0 %vm242_vm1, %v882_v35 }
  0xba   : > { %1652 = vmatprep.subr.bf16.mxu1 %v1746_v4 }
  0xbf   : > { %1649 = vmatmul.mubr.msk.bf16.vlgmr.msra.gmra.mrb[24].mxu1 %vm238_vm3, %v1734_v38 }
  0xc0   : > { %1653 = vmatpush3.bf16.msra.mxu1 %v1167_v41  ;;  %1654 = vmatprep.mubr.msk.bf16.mxu1 %vm1747_vm0, %v1746_v4 }
  0xc1   : > { %1658 = vmatprep.subr.bf16.mxu1 %v1746_v4 }
  0xc2   : > { %1555 = vmatmul.mubr.msk.bf16.vlgmr.msra.gmra.mrb[0].mxu0 %vm238_vm3, %v1732_v25 }
  0xc3   : > { %896 = vmatpush1.bf16.msra.mxu0 %v887_v42  ;;  %927 = vmatprep.mubr.bf16.mxu0 %v1748_v7 }
  0xc4   : > { %1566 = vmatprep.subr.msk.bf16.mxu0 %vm242_vm1, %v1019_v43 }
  0xc5   : > { %v1401_v41 = vpop.permute.xlu0 %1400 }
  0xc7   : > { %1655 = vmatmul.mubr.msk.bf16.vlgmr.msra.gmra.mrb[28].mxu1 %vm238_vm3, %v1735_v45  ;;  %v1406_v39 = vpop.permute.xlu1 %1405 }
  0xc8   : > { %1659 = vmatpush3.bf16.msra.mxu1 %v1304_v46  ;;  %1660 = vmatprep.mubr.msk.bf16.mxu1 %vm1747_vm0, %v1746_v4  ;;  %v1155_v4 = vsel %vm1154_vm9, %v1149_v33, %v1151_v36 }
  0xc9   : > { %v1161_v52 = vsel %vm242_vm1, %v1155_v4, 0 }
  0xce   : > { %1561 = vmatmul.mubr.msk.bf16.vlgmr.msra.gmra.mrb[0].mxu0 %vm238_vm3, %v1733_v31 }
  0xcf   : > { %1033 = vmatpush1.bf16.msra.mxu0 %v1024_v49  ;;  %1661 = vmatmul.mubr.msk.bf16.vlgmr.msra.gmra.mrb[32].mxu1 %vm238_vm3, %v1736_v48 }
  0xd0   : > { %1064 = vmatprep.mubr.bf16.mxu0 %v1748_v7  ;;  %1572 = vmatprep.subr.msk.bf16.mxu0 %vm242_vm1, %v1156_v50 }
  0xda   : > { %1567 = vmatmul.mubr.msk.bf16.vlgmr.msra.gmra.mrb[0].mxu0 %vm238_vm3, %v1734_v38 }
  0xdb   : > { %1170 = vmatpush1.bf16.msra.mxu0 %v1161_v52  ;;  %1201 = vmatprep.mubr.bf16.mxu0 %v1748_v7 }
  0xdc   : > { %1578 = vmatprep.subr.msk.bf16.mxu0 %vm242_vm1, %v1293_v53 }
  0xe6   : > { %1573 = vmatmul.mubr.msk.bf16.vlgmr.msra.gmra.mrb[0].mxu0 %vm238_vm3, %v1735_v45  ;;  %v1428_v45 = vpop.permute.xlu1 %1427 }
  0xe7   : > { %1307 = vmatpush1.bf16.msra.mxu0 %v1298_v55  ;;  %1338 = vmatprep.mubr.bf16.mxu0 %v1748_v7 }
  0xf2   : > { %1579 = vmatmul.mubr.msk.bf16.vlgmr.msra.gmra.mrb[0].mxu0 %vm238_vm3, %v1736_v48 }
 0x162   : > { %v329_v56 = vpop.f32.mrb[0].mxu1 }
 0x163   : > { %v1614_v57 = vpop.f32.mrb[1].mxu1 }
 0x164   : > { %v332_v58 = vpop.f32.mrb[2].mxu1 }
 0x165   : > { %v1615_v59 = vpop.f32.mrb[3].mxu1 }
 0x16a   : > { %v430_v60 = vpop.f32.mrb[4].mxu1 }
 0x16b   : > { %v431_v61 = vadd.f32 %v430_v60, %v329_v56  ;;  %v1620_v62 = vpop.f32.mrb[5].mxu1 }
 0x16c   : > { %v433_v63 = vpop.f32.mrb[6].mxu1 }
 0x16d   : > { %v434_v0 = vadd.f32 %v433_v63, %v332_v58  ;;  %v1621_v1 = vpop.f32.mrb[7].mxu1 }
 0x172   : > { %v561_v2 = vpop.f32.mrb[8].mxu1 }
 0x173   : > { %v570_v3 = vadd.f32 %v561_v2, %v431_v61  ;;  %v1626_v5 = vpop.f32.mrb[9].mxu1 }
 0x174   : > { %v564_v6 = vpop.f32.mrb[10].mxu1 }
 0x175   : > { %v573_v8 = vadd.f32 %v564_v6, %v434_v0  ;;  %v1627_v9 = vpop.f32.mrb[11].mxu1 }
 0x17a   : > { %v698_v10 = vpop.f32.mrb[12].mxu1 }
 0x17b   : > { %v707_v7 = vadd.f32 %v698_v10, %v570_v3  ;;  %v1632_v11 = vpop.f32.mrb[13].mxu1 }
 0x17c   : > { %v701_v12 = vpop.f32.mrb[14].mxu1 }
 0x17d   : > { %v710_v13 = vadd.f32 %v701_v12, %v573_v8  ;;  %v1633_v14 = vpop.f32.mrb[15].mxu1 }
 0x182   : > { %v835_v15 = vpop.f32.mrb[16].mxu1 }
 0x183   : > { %v844_v16 = vadd.f32 %v835_v15, %v707_v7  ;;  %v1638_v17 = vpop.f32.mrb[17].mxu1 }
 0x184   : > { %v838_v18 = vpop.f32.mrb[18].mxu1 }
 0x185   : > { %v847_v19 = vadd.f32 %v838_v18, %v710_v13  ;;  %v1639_v20 = vpop.f32.mrb[19].mxu1 }
 0x18a   : > { %v972_v21 = vpop.f32.mrb[20].mxu1 }
 0x18b   : > { %v981_v22 = vadd.f32 %v972_v21, %v844_v16  ;;  %v1644_v23 = vpop.f32.mrb[21].mxu1 }
 0x18c   : > { %v975_v24 = vpop.f32.mrb[22].mxu1 }
 0x18d   : > { %v984_v25 = vadd.f32 %v975_v24, %v847_v19  ;;  %v1645_v26 = vpop.f32.mrb[23].mxu1 }
 0x192   : > { %v1109_v27 = vpop.f32.mrb[24].mxu1 }
 0x193   : > { %v1118_v28 = vadd.f32 %v1109_v27, %v981_v22  ;;  %v1650_v29 = vpop.f32.mrb[25].mxu1 }
 0x194   : > { %v1112_v30 = vpop.f32.mrb[26].mxu1 }
 0x195   : > { %v1121_v31 = vadd.f32 %v1112_v30, %v984_v25  ;;  %v1651_v32 = vpop.f32.mrb[27].mxu1 }
 0x19a   : > { %v1246_v33 = vpop.f32.mrb[28].mxu1 }
 0x19b   : > { %v1255_v34 = vadd.f32 %v1246_v33, %v1118_v28  ;;  %v1656_v35 = vpop.f32.mrb[29].mxu1 }
 0x19c   : > { %v1249_v36 = vpop.f32.mrb[30].mxu1 }
 0x19d   : > { %v1258_v37 = vadd.f32 %v1249_v36, %v1121_v31  ;;  %v1657_v38 = vpop.f32.mrb[31].mxu1 }
 0x1a2   : > { %v1383_v40 = vpop.f32.mrb[32].mxu1 }
 0x1a3   : > { %v1392_v42 = vadd.f32 %v1383_v40, %v1255_v34  ;;  %v1662_v43 = vpop.f32.mrb[33].mxu1 }
 0x1a4   : > { %v1386_v44 = vpop.f32.mrb[34].mxu1 }
 0x1a5   : > { %v1410_v46 = vadd.f32 %v1401_v41, %v1392_v42  ;;  %v1395_v47 = vadd.f32 %v1386_v44, %v1258_v37  ;;  %v1663_v48 = vpop.f32.mrb[35].mxu1 }
 0x1a7   : > { %vm1416_vm11 = vcmp.ge.f32.partialorder %v1410_v46, 0.0  ;;  %v1413_v49 = vadd.f32 %v1406_v39, %v1395_v47  ;;  %v1432_v50 = vmul.f32 %v1428_v45, %v1410_v46 }
 0x1a9   : > { %vm1419_vm12 = vcmp.ge.f32.partialorder %v1413_v49, 0.0  ;;  %v1435_v4 = vmul.f32 %v1428_v45, %v1413_v49  ;;  %v1438_v51 = vsel %vm1416_vm11, %v1410_v46, %v1432_v50 }
 0x1aa   : > { %v1589_v52 = vpack.c.bf16 %v1438_v51, %v1438_v51 }
 0x1ab   : > { %v1441_v53 = vsel %vm1419_vm12, %v1413_v49, %v1435_v4 }
 0x1ac   : > { %v1591_v54 = vpack.c.bf16 %v1441_v53, %v1441_v53  ;;  %1464 = vst.msk [vmem:[%s199_s30 + $0x8] sm:$0xf] %vm1463_vm13, %v1589_v52 }
 0x1ae   : > { %1466 = vst.msk [vmem:[%s199_s30 + $0x14] sm:$0xf] %vm1463_vm13, %v1591_v54 }
 0x1c5   : > { %v1340_v55 = vpop.f32.mrb[0].mxu0 }
 0x1c6   : > { %v1408_v56 = vadd.f32 %v1401_v41, %v1340_v55  ;;  %v1342_v57 = vpop.f32.mrb[1].mxu0 }
 0x1c7   : > { %v1409_v58 = vadd.f32 %v1401_v41, %v1342_v57  ;;  %v1344_v59 = vpop.f32.mrb[2].mxu0 }
 0x1c8   : > { %vm1414_vm14 = vcmp.ge.f32.partialorder %v1408_v56, 0.0  ;;  %v1430_v60 = vmul.f32 %v1428_v45, %v1408_v56  ;;  %v1411_v61 = vadd.f32 %v1406_v39, %v1344_v59  ;;  %v1346_v62 = vpop.f32.mrb[3].mxu0 }
 0x1c9   : > { %vm1415_vm15 = vcmp.ge.f32.partialorder %v1409_v58, 0.0  ;;  %v1431_v63 = vmul.f32 %v1428_v45, %v1409_v58  ;;  %v1412_v0 = vadd.f32 %v1406_v39, %v1346_v62 }
 0x1ca   : > { %v1436_v1 = vsel %vm1414_vm14, %v1408_v56, %v1430_v60  ;;  %vm1417_vm0 = vcmp.ge.f32.partialorder %v1411_v61, 0.0  ;;  %v1433_v2 = vmul.f32 %v1428_v45, %v1411_v61 }
 0x1cb   : > { %v1437_v3 = vsel %vm1415_vm15, %v1409_v58, %v1431_v63  ;;  %vm1418_vm1 = vcmp.ge.f32.partialorder %v1412_v0, 0.0  ;;  %v1434_v5 = vmul.f32 %v1428_v45, %v1412_v0 }
 0x1cc   : > { %v1588_v6 = vpack.c.bf16 %v1437_v3, %v1436_v1  ;;  %v1439_v8 = vsel %vm1417_vm0, %v1411_v61, %v1433_v2 }
 0x1cd   : > { %v1440_v9 = vsel %vm1418_vm1, %v1412_v0, %v1434_v5 }
 0x1ce   : > { %1462 = vst [vmem:[%s199_s30] sm:$0xff] %v1588_v6  ;;  %v1590_v10 = vpack.c.bf16 %v1440_v9, %v1439_v8 }
 0x1d0   : > { %1465 = vst [vmem:[%s199_s30 + $0xc] sm:$0xff] %v1590_v10 }
 0x1d1 PF: > { %s16_s17 = sadd.s32 1, %s1743_s17  }
 0x1d2   : > { %p13_p4 = scmp.ge.s32.totalorder %s16_s17, 4  }
 0x1d4   :  { %15 = sbr.rel (!%p13_p4) target bundleno = 3 (0x3), region = 74 }

</bundles_post_ra>
